<compile_context>
chip_gen: v7x
topology: tpu7x:2x2x1
jax: 0.10.0
libtpu: 0.0.40
codegen_flags: <defaults>
</compile_context>

<pallas_src>
import functools

import jax
import jax.numpy as jnp
from jax import lax
from jax.experimental import pallas as pl
from jax.experimental.pallas import tpu as pltpu


def _round_up(x, m):
    return (x + m - 1) // m * m


def _physical_vmem_bytes():
    """Physical VMEM of the current TPU generation."""
    try:
        info = pltpu.get_tpu_info()
        cap = int(getattr(info, "vmem_capacity_bytes", 0) or 0)
        if cap > 0:
            return cap
    except Exception:
        pass
    # Fallback: infer generation from device_kind instead of always assuming
    # the v7x floor (which would silently halve the tile budget on v5e/v6e).
    try:
        kind = jax.devices()[0].device_kind.lower()
    except Exception:
        kind = ""
    if any(tag in kind for tag in ("v4", "v5", "v6")):
        return 128 * 1024 * 1024
    return 64 * 1024 * 1024  # v7x and unknown generations


def _block_spec(shape, index_map, single_buffer=False):
    """BlockSpec helper; optionally single-buffers a grid-resident block."""
    if single_buffer and hasattr(pl, "Buffered"):
        try:
            return pl.BlockSpec(shape, index_map,
                                pipeline_mode=pl.Buffered(buffer_count=1))
        except TypeError:
            pass  # older jax without pipeline_mode: fall back to default buffering
    return pl.BlockSpec(shape, index_map)


def _choose_tiles(B, S1, S2, D1, D2, t1_item, t2_item, w_item, m_item, o_item,
                  budget, w_single):
    """Pick (TB, TS1): batches folded per grid step and S1 rows per grid step."""
    ROW_TARGET = 256  # amortize ~0.35us per-grid-step overhead / fill MXU rows

    def vmem_bytes(tb, ts1):
        b = 2 * tb * ts1 * D1 * t1_item            # t1 tile, double-buffered
        b += 2 * tb * ts1 * S2 * m_item            # mask tile, double-buffered
        b += 2 * tb * ts1 * S2 * o_item            # out tile, double-buffered
        b += 2 * tb * S2 * D2 * t2_item            # t2 (index changes only with batch)
        b += (1 if w_single else 2) * D1 * D2 * w_item
        b += tb * ts1 * (3 * S2 + 2 * D2) * 4      # f32 temporaries (sim/exp/t1w)
        b += tb * (ts1 * D1 + S2 * D2) * 2         # in-kernel bf16 copies of t1/t2
        return b

    # Case 1: a full-S1 row block fits -> no S1 padding, no post-kernel slice.
    if vmem_bytes(1, S1) <= budget:
        tb, ts1 = 1, S1
        if S1 < ROW_TARGET and B > 1:
            # Fold whole batches per grid step, but cap at B//2 so at least two
            # grid steps remain (keeps both v7x TensorCores busy).
            want = min(max(1, B // 2), max(1, ROW_TARGET // max(S1, 1)))
            for cand in range(want, 0, -1):
                if B % cand == 0 and vmem_bytes(cand, S1) <= budget:
                    tb = cand
                    break
        if B // tb == 1 and S1 % 16 == 0 and S1 >= 16:
            ts1 = S1 // 2  # grid would be (1, 1): split rows so the 2nd TC has work
        return tb, ts1

    # Case 2: tile S1.  Prefer (a) tiles that divide S1 exactly (kills the
    # post-kernel output slice), (b) multiples of 256 (v6e/v7x MXU rows) then
    # 128, (c) the largest tile that fits the VMEM budget.
    cap = min(_round_up(S1, 8), 1024)
    fitting = [t for t in range(8, cap + 1, 8) if vmem_bytes(1, t) <= budget]
    if not fitting:
        return 1, 8  # degenerate fallback: tiny row tile, correctness preserved

    def score(t):
        pad = _round_up(S1, t) - S1
        return (pad == 0 and t >= min(128, S1), t % 256 == 0, t % 128 == 0, -pad, t)

    return 1, max(fitting, key=score)


def _attention_kernel(w_ref, t1_ref, t2_ref, mask_ref, out_ref, *,
                      compute_dtype, exact_softmax):
    """Blocks:
         w    : (D1, D2)        input dtype, grid-resident
         t1   : (TB, TS1, D1)   input dtype
         t2   : (TB, S2, D2)    input dtype, resident across the row axis
         mask : (TB, TS1, S2)   caller dtype (nonzero = masked)
         out  : (TB, TS1, S2)   out dtype
    """
    tb, ts1, d1 = t1_ref.shape
    d2 = w_ref.shape[1]

    # Cast to the MXU compute dtype *in-kernel*: each element is DMA'd exactly
    # once in its input dtype; a wrapper-side cast would add a full HBM pass.
    w = w_ref[...].astype(compute_dtype)
    t1 = t1_ref[...].reshape(tb * ts1, d1).astype(compute_dtype)
    t2 = t2_ref[...].astype(compute_dtype)

    # (TB*TS1, D1) @ (D1, D2): fold batch and row dims into one MXU pass.
    t1w = jnp.dot(t1, w, preferred_element_type=jnp.float32)
    t1w = t1w.reshape(tb, ts1, d2).astype(compute_dtype)

    # Batched contraction over D2 -- no materialized transpose of t2.
    sim = lax.dot_general(
        t1w, t2,
        dimension_numbers=(((2,), (2,)), ((0,), (0,))),
        preferred_element_type=jnp.float32,
    )  # (TB, TS1, S2) float32

    # masked_fill_(mask.byte(), -inf): compare the mask ref directly, no dtype
    # up-conversion.  Fully-masked rows give NaN, matching PyTorch semantics.
    m = mask_ref[...]
    cond = m if m.dtype == jnp.bool_ else (m != 0)
    masked = jnp.where(cond, -jnp.inf, sim)

    # Numerically-stable row-wise softmax.
    mx = jnp.max(masked, axis=-1, keepdims=True)
    e = jnp.exp(masked - mx)
    s = jnp.sum(e, axis=-1, keepdims=True)
    if exact_softmax:
        out = e / s
    else:
        out = e * pl.reciprocal(s, approx=True)   # EUP slot, ~free
    out_ref[...] = out.astype(out_ref.dtype)


def attention(w, tensor_1, tensor_2, mask, *, compute_dtype=None,
              out_dtype=jnp.float32, exact_softmax=False):
    """softmax(masked_fill(tensor_1 @ W @ tensor_2^T, mask != 0, -inf), axis=-1).

    w: (D1, D2); tensor_1: (B, S1, D1); tensor_2: (B, S2, D2);
    mask: (B, S1, S2), nonzero = masked.  Returns (B, S1, S2) in `out_dtype`.

    compute_dtype=None -> bfloat16 matmuls with f32 accumulation (native MXU
    path on v5e/v6e/v7x).  Pass jnp.float32 for full-precision matmuls.
    """
    B, S1, D1 = tensor_1.shape
    B2, S2, D2 = tensor_2.shape
    assert B2 == B and w.shape == (D1, D2) and mask.shape == (B, S1, S2)

    if compute_dtype is None:
        compute_dtype = jnp.bfloat16

    # Mask travels in its native dtype (no wrapper conversion pass).  Only a
    # bool mask is repacked to int8 (same byte width) for a simple TPU load path.
    mask_in = mask.astype(jnp.int8) if mask.dtype == jnp.bool_ else mask

    # VMEM budget per TPU generation; ~90% of the limit minus fixed compiler
    # headroom (the tile estimator already accounts for double buffering).
    vmem_cap = _physical_vmem_bytes()
    vmem_limit = (vmem_cap * 9) // 10
    vmem_budget = max(int(vmem_limit * 0.9) - 6 * 1024 * 1024, vmem_limit // 2)

    # Single-buffer grid-resident blocks when they are big enough to matter.
    w_single = D1 * D2 * jnp.dtype(w.dtype).itemsize >= 512 * 1024

    TB, TS1 = _choose_tiles(
        B, S1, S2, D1, D2,
        jnp.dtype(tensor_1.dtype).itemsize, jnp.dtype(tensor_2.dtype).itemsize,
        jnp.dtype(w.dtype).itemsize, jnp.dtype(mask_in.dtype).itemsize,
        jnp.dtype(out_dtype).itemsize, vmem_budget, w_single)

    t2_single = (B // TB == 1) and \
        (TB * S2 * D2 * jnp.dtype(tensor_2.dtype).itemsize >= 512 * 1024)

    # Pad S1 only when the chosen row tile does not divide it (the tile chooser
    # strongly prefers exact divisors, so this is rare).  S2 is never padded:
    # full-S2 blocks avoid both a mask-pad pass and a post-kernel output slice.
    S1p = _round_up(S1, TS1)
    t1 = tensor_1
    if S1p != S1:
        t1 = jnp.pad(t1, ((0, 0), (0, S1p - S1), (0, 0)))
        mask_in = jnp.pad(mask_in, ((0, 0), (0, S1p - S1), (0, 0)),
                          constant_values=1)

    grid = (B // TB, S1p // TS1)

    kernel = functools.partial(_attention_kernel, compute_dtype=compute_dtype,
                               exact_softmax=exact_softmax)

    # TODO(synk): for very large D1/D2 (>= ~4096) add a K-tiling ("arbitrary")
    # grid axis with an f32 accumulator for t1 @ W; unnecessary at typical sizes.
    out = pl.pallas_call(
        kernel,
        out_shape=jax.ShapeDtypeStruct((B, S1p, S2), out_dtype),
        grid_spec=pltpu.PrefetchScalarGridSpec(
            num_scalar_prefetch=0,
            grid=grid,
            in_specs=[
                _block_spec((D1, D2), lambda b, s: (0, 0), single_buffer=w_single),
                pl.BlockSpec((TB, TS1, D1), lambda b, s: (b, s, 0)),
                _block_spec((TB, S2, D2), lambda b, s: (b, 0, 0),
                            single_buffer=t2_single),
                pl.BlockSpec((TB, TS1, S2), lambda b, s: (b, s, 0)),
            ],
            out_specs=pl.BlockSpec((TB, TS1, S2), lambda b, s: (b, s, 0)),
        ),
        compiler_params=pltpu.CompilerParams(
            # Both axes are independent: shards across the 2 TensorCores on v7x.
            dimension_semantics=("parallel", "parallel"),
            vmem_limit_bytes=int(vmem_limit),
        ),
    )(w, t1, tensor_2, mask_in)

    if S1p != S1:
        out = out[:, :S1, :]
    return out


def _reference(w, t1, t2, mask):
    sim = jnp.einsum("bid,de,bje->bij", t1, w, t2)
    sim = jnp.where(mask != 0, -jnp.inf, sim)
    return jax.nn.softmax(sim, axis=-1)


if __name__ == "__main__":
    key = jax.random.PRNGKey(0)
    k_w, k_t1, k_t2, k_m = jax.random.split(key, 4)

    # Config 1: small shapes consistent with the module's forward.
    B, S1, S2, D1, D2 = 2, 8, 16, 32, 32

    w = jax.random.normal(k_w, (D1, D2), dtype=jnp.float32) * 0.1
    tensor_1 = jax.random.normal(k_t1, (B, S1, D1), dtype=jnp.float32)
    tensor_2 = jax.random.normal(k_t2, (B, S2, D2), dtype=jnp.float32)

    # Random int mask (nonzero = masked); keep at least one unmasked key per
    # row (a fully-masked row yields NaN, matching PyTorch masked_fill+softmax).
    mask = (jax.random.uniform(k_m, (B, S1, S2)) > 0.7).astype(jnp.int32)
    mask = mask.at[:, :, 0].set(0)

    ref = _reference(w, tensor_1, tensor_2, mask)

    # f32 compute path with exact softmax divide -- strict parity check.
    out_f32 = attention(w, tensor_1, tensor_2, mask,
                        compute_dtype=jnp.float32, exact_softmax=True)
    jax.block_until_ready(out_f32)
    assert out_f32.shape == (B, S1, S2)
    assert jnp.allclose(out_f32, ref, atol=5e-3, rtol=5e-3), "f32 mismatch vs reference"

    # Default path: bf16 MXU matmuls (f32 accumulation) + approx reciprocal.
    out_def = attention(w, tensor_1, tensor_2, mask)
    jax.block_until_ready(out_def)
    assert out_def.shape == (B, S1, S2)
    assert jnp.allclose(out_def, ref, atol=8e-2), "bf16 mismatch vs reference"

    # Config 2: exercises batch folding (TB > 1), a bool mask and bf16 output.
    kb = jax.random.split(key, 8)
    Bb, S1b, S2b, D1b, D2b = 4, 8, 24, 16, 48
    w2 = jax.random.normal(kb[4], (D1b, D2b), dtype=jnp.float32) * 0.1
    t1b = jax.random.normal(kb[5], (Bb, S1b, D1b), dtype=jnp.float32)
    t2b = jax.random.normal(kb[6], (Bb, S2b, D2b), dtype=jnp.float32)
    maskb = jax.random.uniform(kb[7], (Bb, S1b, S2b)) > 0.6
    maskb = maskb.at[:, :, 0].set(False)

    ref2 = _reference(w2, t1b, t2b, maskb)
    out2 = attention(w2, t1b, t2b, maskb, out_dtype=jnp.bfloat16)
    jax.block_until_ready(out2)
    assert out2.shape == (Bb, S1b, S2b)
    assert jnp.allclose(out2.astype(jnp.float32), ref2, atol=1e-1), \
        "folded/bool-mask mismatch vs reference"

    # TODO(synk): 'sparsemax' normaliser branch not implemented; only softmax.
    print("KERNEL_OK")
</pallas_src>

<mosaic_0001>
module attributes {stable_mosaic.version = 11 : i64} {
  func.func @_attention_kernel(%arg0: i32, %arg1: i32, %arg2: memref<32x32xf32, #tpu.memory_space<vmem>>, %arg3: memref<1x8x32xf32, #tpu.memory_space<vmem>>, %arg4: memref<1x16x32xf32, #tpu.memory_space<vmem>>, %arg5: memref<1x8x16xi32, #tpu.memory_space<vmem>>, %arg6: memref<1x8x16xf32, #tpu.memory_space<vmem>>) attributes {dimension_semantics = [#tpu.dimension_semantics<parallel>, #tpu.dimension_semantics<parallel>], iteration_bounds = array<i64: 2, 1>, scalar_prefetch = 0 : i64, scratch_operands = 0 : i64, tpu.core_type = #tpu.core_type<tc>, window_params = [{pipeline_mode = #tpu.pipeline_mode<synchronous>, transform_indices = @transform_0, window_bounds = array<i64: 32, 32>}, {transform_indices = @transform_1, window_bounds = array<i64: 1, 8, 32>}, {transform_indices = @transform_2, window_bounds = array<i64: 1, 16, 32>}, {transform_indices = @transform_3, window_bounds = array<i64: 1, 8, 16>}, {transform_indices = @transform_4, window_bounds = array<i64: 1, 8, 16>}]} {
    %c0 = arith.constant 0 : index
    %c0_0 = arith.constant 0 : index
    %0 = vector.load %arg2[%c0, %c0_0] : memref<32x32xf32, #tpu.memory_space<vmem>>, vector<32x32xf32>
    %c0_1 = arith.constant 0 : index
    %c0_2 = arith.constant 0 : index
    %c0_3 = arith.constant 0 : index
    %1 = vector.load %arg3[%c0_1, %c0_2, %c0_3] : memref<1x8x32xf32, #tpu.memory_space<vmem>>, vector<1x8x32xf32>
    %2 = vector.shape_cast %1 : vector<1x8x32xf32> to vector<8x32xf32>
    %c0_4 = arith.constant 0 : index
    %c0_5 = arith.constant 0 : index
    %c0_6 = arith.constant 0 : index
    %3 = vector.load %arg4[%c0_4, %c0_5, %c0_6] : memref<1x16x32xf32, #tpu.memory_space<vmem>>, vector<1x16x32xf32>
    %cst = arith.constant dense<0.000000e+00> : vector<8x32xf32>
    %4 = tpu.matmul %2, %0, %cst {dimension_numbers = #tpu.dot_dimension_numbers<[1], [0], [0], [1], [0, 0, 1, 1], [], []>} : vector<8x32xf32>, vector<32x32xf32>, vector<8x32xf32> -> vector<8x32xf32>
    %5 = vector.shape_cast %4 : vector<8x32xf32> to vector<1x8x32xf32>
    %cst_7 = arith.constant dense<0.000000e+00> : vector<1x8x16xf32>
    %6 = tpu.matmul %5, %3, %cst_7 {dimension_numbers = #tpu.dot_dimension_numbers<[2], [2], [1], [1], [0, 0, 0, 1, 1, 1], [0], [0]>} : vector<1x8x32xf32>, vector<1x16x32xf32>, vector<1x8x16xf32> -> vector<1x8x16xf32>
    %c0_8 = arith.constant 0 : index
    %c0_9 = arith.constant 0 : index
    %c0_10 = arith.constant 0 : index
    %7 = vector.load %arg5[%c0_8, %c0_9, %c0_10] : memref<1x8x16xi32, #tpu.memory_space<vmem>>, vector<1x8x16xi32>
    %c0_i32 = arith.constant 0 : i32
    %8 = vector.broadcast %c0_i32 : i32 to vector<1x8x16xi32>
    %9 = arith.cmpi ne, %7, %8 : vector<1x8x16xi32>
    %cst_11 = arith.constant 0xFF800000 : f32
    %10 = vector.broadcast %cst_11 : f32 to vector<1x8x16xf32>
    %11 = arith.select %9, %10, %6 : vector<1x8x16xi1>, vector<1x8x16xf32>
    %cst_12 = arith.constant dense<0xFF800000> : vector<1x8xf32>
    %12 = vector.multi_reduction <maximumf>, %11, %cst_12 [2] : vector<1x8x16xf32> to vector<1x8xf32>
    %13 = vector.shape_cast %12 : vector<1x8xf32> to vector<1x8x1xf32>
    %14 = vector.broadcast %13 : vector<1x8x1xf32> to vector<1x8x16xf32>
    %15 = arith.subf %11, %14 : vector<1x8x16xf32>
    %16 = math.exp %15 : vector<1x8x16xf32>
    %cst_13 = arith.constant dense<0.000000e+00> : vector<1x8xf32>
    %17 = vector.multi_reduction <add>, %16, %cst_13 [2] : vector<1x8x16xf32> to vector<1x8xf32>
    %18 = vector.shape_cast %17 : vector<1x8xf32> to vector<1x8x1xf32>
    %19 = vector.broadcast %18 : vector<1x8x1xf32> to vector<1x8x16xf32>
    %20 = arith.divf %16, %19 : vector<1x8x16xf32>
    %c0_14 = arith.constant 0 : index
    %c0_15 = arith.constant 0 : index
    %c0_16 = arith.constant 0 : index
    %21 = vector.load %arg6[%c0_14, %c0_15, %c0_16] : memref<1x8x16xf32, #tpu.memory_space<vmem>>, vector<1x8x16xf32>
    tpu.vector_store %arg6[%c0_14, %c0_15, %c0_16], %20 {strides = array<i32>} : memref<1x8x16xf32, #tpu.memory_space<vmem>>, vector<1x8x16xf32>,
    return
  }
  func.func @transform_0(%arg0: i32, %arg1: i32) -> (i32, i32) {
    %c0_i32 = arith.constant 0 : i32
    %c0_i32_0 = arith.constant 0 : i32
    %c0_i32_1 = arith.constant 0 : i32
    return %c0_i32, %c0_i32_0 : i32, i32
  }
  func.func @transform_1(%arg0: i32, %arg1: i32) -> (i32, i32, i32) {
    %c0_i32 = arith.constant 0 : i32
    %c0_i32_0 = arith.constant 0 : i32
    return %arg0, %arg1, %c0_i32 : i32, i32, i32
  }
  func.func @transform_2(%arg0: i32, %arg1: i32) -> (i32, i32, i32) {
    %c0_i32 = arith.constant 0 : i32
    %c0_i32_0 = arith.constant 0 : i32
    %c0_i32_1 = arith.constant 0 : i32
    return %arg0, %c0_i32, %c0_i32_0 : i32, i32, i32
  }
  func.func @transform_3(%arg0: i32, %arg1: i32) -> (i32, i32, i32) {
    %c0_i32 = arith.constant 0 : i32
    %c0_i32_0 = arith.constant 0 : i32
    return %arg0, %arg1, %c0_i32 : i32, i32, i32
  }
  func.func @transform_4(%arg0: i32, %arg1: i32) -> (i32, i32, i32) {
    %c0_i32 = arith.constant 0 : i32
    %c0_i32_0 = arith.constant 0 : i32
    return %arg0, %arg1, %c0_i32 : i32, i32, i32
  }
}

</mosaic_0001>

<bundles_post_ra>
// kernel: tpu_custom_call.1
= control target key start
LH: loop header
LB: loop body
LE: loop exit
PB: predicated region body
PF: predicated region fallthrough
CT: control target
= control target key end

     0   :  { %s1353_s0 = inlined_call_operand.hbm [shape: f32[32,32], index: 0, kind: input, shape index: {}]   ;;  %s1354_s1 = inlined_call_operand.hbm [shape: f32[2,8,32], index: 1, kind: input, shape index: {}]   ;;  %s1355_s2 = inlined_call_operand.hbm [shape: f32[2,16,32], index: 2, kind: input, shape index: {}]   ;;  %s1356_s3 = inlined_call_operand.hbm [shape: s32[2,8,16], index: 3, kind: input, shape index: {}]   ;;  %s1357_s4 = inlined_call_operand.hbm [shape: f32[2,8,16], index: 4, kind: output, shape index: {}]  }
   0x1   :  { %1371 = sst [smem:[#allocation18_spill]] %s1354_s1 }
   0x2   :  { %1372 = sst [smem:[#allocation19_spill]] %s1355_s2 }
   0x3   :  { %9 = vsyncpa [#allocation3], 0 }
   0x4   :  { %10 = vsyncpa [#allocation6], 0 }
   0x5   :  { %12 = vsyncpa [#allocation6 + $0x1], 0 }
   0x6   :  { %13 = vsyncpa [#allocation9], 0 }
   0x7   :  { %15 = vsyncpa [#allocation9 + $0x1], 0 }
   0x8   :  { %16 = vsyncpa [#allocation4], 0 }
   0x9   :  { %18 = vsyncpa [#allocation4 + $0x1], 0  ;;  %s1049_s15 = smov 0   ;;  %s1051_s16 = smov 0  }
   0xa   :  { %s1053_s17 = smov 0   ;;  %s1055_s18 = smov 0  }
   0xb   :  { %s1057_s19 = smov 0   ;;  %s1059_s20 = smov 0  }
   0xc LB: > { %1373 = sst [smem:[#allocation15_spill]] %s1000_s17  ;;  %s36_s21 = sadd.s32 1, %s1008_s19  ;;  %s1012_s20 = sphi %s1059_s20, %s24_s20   ;;  %s1008_s19 = sphi %s1057_s19, %s1404_s19   ;;  %s1004_s18 = sphi %s1055_s18, %s1403_s18   ;;  %s1000_s17 = sphi %s1053_s17, %s1399_s17   ;;  %s996_s16 = sphi %s1051_s16, %s1402_s16   ;;  %s992_s15 = sphi %s1049_s15, %s1401_s15  }
   0xd   : > { %s66_s22 = sadd.s32 1, %s1000_s17  ;;  %p38_p0 = scmp.ge.s32.totalorder %s36_s21, 2 }
   0xe   : > { %p1358_p1 = scmp.ne.s32.totalorder %s1000_s17, %s996_s16  ;;  %p74_p2 = scmp.eq.s32.totalorder %s1012_s20, 0 }
   0xf   : > { %s1406_s21 = smov (%p38_p0, %s36_s21), 0  ;;  %p743_p5 = scmp.lt.s32.totalorder %s1012_s20, 2 }
  0x10   : > { %1374 = sst [smem:[#allocation16_spill]] %s1406_s21  ;;  %p75_p4 = por %p74_p2, %p1358_p1 }
  0x11   : > { %s61_s23 = ssub.s32 %s1008_s19, %s1406_s21  ;;  %s198_s24 = sand.u32 1, %s1012_s20  }
  0x12   : > { %p64_p6 = scmp.eq.s32.totalorder %s61_s23, 0  ;;  %s1095_s25 = sand.u32 1, %s1000_s17  }
  0x13   : > { %s1360_s26 = sshll.u32 %s1008_s19, 7  ;;  %s1359_s28 = sshll.u32 %s1095_s25, 3 }
  0x14   : > { %s1099_s27 = scalar_select %p64_p6, %s1000_s17, %s66_s22  }
  0x15   : > { %s1376_s1 = sld [smem:[#allocation18_spill]]  ;;  %p1109_p7 = pnand %p743_p5, %p75_p4 }
  0x16   : > { %1375 = sst [smem:[#allocation17_spill]] %s1099_s27  ;;  %s202_s7 = scalar_lea.vmem [#allocation5], %s1359_s28 }
  0x17   : > { %s1377_s6 = scalar_select %p1109_p7, 1, 0 }
  0x18   : > { %s210_s8 = sshll.u32 %s202_s7, 4  ;;  %s656_s9 = sshll.u32 %s1095_s25, 4  ;;  %s1116_s8 = int_to_ptr.vmem [resolvable:$true] %s210_s8 }
  0x19   : > { %s1118_s10 = scalar_lea.sflag [#allocation6], %s198_s24  ;;  %p1124_p9 = pneg %p1109_p7 }
  0x1b   : > { %s1107_s5 = scalar_lea.hbm %s1376_s1, %s1360_s26  ;;  %s809_s22 = scalar_lea.hbm %s1376_s1, 256 }
  0x1c   : > { %s804_s11 = scalar_lea.hbm %s1107_s5, 128  ;;  %p810_p12 = scmp.lt.u32.totalorder %s1107_s5, %s1376_s1 }
  0x1d   : > { %p805_p8 = scmp.ne.s32.totalorder %s1107_s5, %s804_s11  ;;  %p811_p13 = scmp.lt.u32.totalorder %s809_s22, %s804_s11 }
  0x1e   : > { %s1378_s12 = scalar_select %p1124_p9, 1, 0 }
  0x1f   : > { %p807_p10 = pnand %p1124_p9, %p805_p8  ;;  %p812_p0 = por %p811_p13, %p810_p12 }
  0x20   : > { %p813_p2 = scmp.lt.u32.totalorder %s804_s11, %s1107_s5 }
  0x21   : > { %p808_p11 = pneg %p807_p10 }
  0x22   : > { %p814_p4 = por %p813_p2, %p812_p0 }
  0x24   : > { %p815_p5 = pnand %p814_p4, %p808_p11 }
  0x26   : > { %818 = shalt.err (!%p815_p5)
}
  0x27   : > { %s819_s24 = scalar_lea.vmem %s1116_s8, 128  ;;  %s1014_s30 = smov [#allocation5]  }
  0x28   : > { %p820_p6 = scmp.ne.s32.totalorder %s1116_s8, %s819_s24  ;;  %s824_s7 = sshll.u32 %s1014_s30, 4  ;;  %s825_s7 = int_to_ptr.vmem [resolvable:$false] %s824_s7 }
  0x29   : > { %s826_s13 = scalar_lea.vmem %s825_s7, 256  ;;  %p827_p3 = scmp.lt.s32.totalorder %s1116_s8, %s825_s7 }
  0x2a   : > { %p822_p8 = pnand %p820_p6, %p1124_p9  ;;  %p828_p1 = scmp.lt.s32.totalorder %s826_s13, %s819_s24 }
  0x2c   : > { %p823_p10 = pneg %p822_p8  ;;  %p829_p12 = por %p828_p1, %p827_p3 }
  0x2e   : > { %p830_p13 = pnand %p829_p12, %p823_p10 }
  0x30   : > { %833 = shalt.err (!%p830_p13)
}
  0x31   : > { %731 = dma.hbm_to_vmem [thread:$0]  (!%p1109_p7), %s1107_s5, 128, %s1116_s8, %s1118_s10  }
  0x32   : > { %s221_s11 = scalar_lea.vmem [#allocation7], %s656_s9  ;;  %s1153_s22 = sadd.s32 4294967295, %s1012_s20  }
  0x33   : > { %s228_s14 = sshll.u32 %s221_s11, 4  ;;  %s650_s23 = sadd.s32 4294967294, %s1012_s20   ;;  %s1150_s14 = int_to_ptr.vmem [resolvable:$true] %s228_s14 }
  0x34   : > { %p79_p1 = scmp.ne.s32.totalorder %s996_s16, %s992_s15  ;;  %p1363_p3 = scmp.eq.s32.totalorder %s1153_s22, 0 }
  0x35   : > { %p159_p11 = scmp.eq.s32.totalorder %s1153_s22, 1  ;;  %p165_p0 = scmp.eq.s32.totalorder %s650_s23, 1 }
  0x36   : > { %p651_p2 = scmp.ge.s32.totalorder %s1012_s20, 1  ;;  %p1163_p4 = por %p1363_p3, %p79_p1 }
  0x37   : > { %p1380_p5 = scmp.ne.s32.totalorder %s1000_s17, %s996_s16  ;;  %p1174_p8 = por %p165_p0, %p79_p1 }
  0x38   : > { %s1379_s5 = scalar_select %p1163_p4, 1, 0 }
  0x39   : > { %p1170_p6 = por %p159_p11, %p1380_p5  ;;  %p172_p10 = scmp.lt.s32.totalorder %s1012_s20, 3 }
  0x3a   : > { %s1382_s9 = scalar_select %p1174_p8, 1, 0 }
  0x3b   : > { %s1381_s8 = scalar_select %p1170_p6, 1, 0 }
  0x3c   : > { %p1179_p12 = pnand %p651_p2, %p172_p10  ;;  %s1015_s24 = smov [#allocation2]  }
  0x3d   : > { %s184_s30 = sshll.u32 %s1015_s24, 4  ;;  %s675_s7 = sshll.u32 %s1008_s19, 8  ;;  %s1183_s30 = int_to_ptr.vmem [resolvable:$true] %s184_s30 }
  0x3e   : > { %s1383_s29 = scalar_select %p1179_p12, 1, 0 }
  0x3f   : > { %p724_p13 = pneg %p1179_p12  ;;  %s1385_s2 = sld [smem:[#allocation19_spill]] }
  0x41   : > { %p1190_p11 = pnand %p724_p13, %p1363_p3 }
  0x43   : > { %s1384_s13 = scalar_select %p1190_p11, 1, 0 }
  0x45   : > { %s1197_s28 = scalar_lea.hbm %s1385_s2, %s675_s7  ;;  %s839_s21 = scalar_lea.hbm %s1385_s2, 512 }
  0x46   : > { %s834_s24 = scalar_lea.hbm %s1197_s28, 256  ;;  %p840_p5 = scmp.lt.u32.totalorder %s1197_s28, %s1385_s2 }
  0x47   : > { %p835_p1 = scmp.ne.s32.totalorder %s1197_s28, %s834_s24  ;;  %p841_p10 = scmp.lt.u32.totalorder %s839_s21, %s834_s24 }
  0x48   : > { %p843_p3 = scmp.lt.u32.totalorder %s834_s24, %s1197_s28 }
  0x49   : > { %p837_p0 = pnand %p835_p1, %p1124_p9  ;;  %p842_p13 = por %p841_p10, %p840_p5 }
  0x4b   : > { %p838_p2 = pneg %p837_p0  ;;  %p844_p8 = por %p843_p3, %p842_p13 }
  0x4d   : > { %p845_p6 = pnand %p844_p8, %p838_p2 }
  0x4f   : > { %848 = shalt.err (!%p845_p6)
}
  0x50   : > { %s849_s7 = scalar_lea.vmem %s1150_s14, 256  ;;  %s1016_s1 = smov [#allocation7]  }
  0x51   : > { %p850_p1 = scmp.ne.s32.totalorder %s1150_s14, %s849_s7  ;;  %s854_s26 = sshll.u32 %s1016_s1, 4  ;;  %s855_s26 = int_to_ptr.vmem [resolvable:$false] %s854_s26 }
  0x52   : > { %s856_s17 = scalar_lea.vmem %s855_s26, 512  ;;  %p857_p12 = scmp.lt.s32.totalorder %s1150_s14, %s855_s26 }
  0x53   : > { %p852_p0 = pnand %p850_p1, %p1124_p9  ;;  %p858_p11 = scmp.lt.s32.totalorder %s856_s17, %s849_s7 }
  0x55   : > { %p853_p4 = pneg %p852_p0  ;;  %p859_p5 = por %p858_p11, %p857_p12 }
  0x57   : > { %p860_p10 = pnand %p859_p5, %p853_p4 }
  0x59   : > { %863 = shalt.err (!%p860_p10)
}
  0x5a   : > { %s1017_s21 = smov 128   ;;  %s1018_s27 = smov 8  }
  0x5b   : > { %734 = dma.hbm_to_vmem [thread:$0]  (!%p1109_p7), %s1197_s28, 256, %s1150_s14, %s1118_s10, %s1017_s21, %s1017_s21, %s1018_s27  }
  0x5c   : > { %s864_s24 = scalar_lea.hbm %s1353_s0, 512  ;;  %p1386_p6 = scmp.ne.s32.totalorder %s1384_s13, 0 }
  0x5d   : > { %p865_p3 = scmp.ne.s32.totalorder %s1353_s0, %s864_s24  ;;  %p871_p11 = scmp.lt.u32.totalorder %s864_s24, %s1353_s0 }
  0x5e   : > { %p866_p4 = pneg %p1386_p6 }
  0x60   : > { %p867_p8 = pnand %p866_p4, %p865_p3 }
  0x62   : > { %p868_p12 = pneg %p867_p8 }
  0x64   : > { %p873_p2 = pnand %p871_p11, %p868_p12 }
  0x66   : > { %876 = shalt.err (!%p873_p2)
}
  0x67   : > { %s877_s28 = scalar_lea.vmem %s1183_s30, 512  ;;  %p885_p5 = scmp.lt.s32.totalorder %s1183_s30, %s1183_s30 }
  0x68   : > { %p878_p13 = scmp.ne.s32.totalorder %s1183_s30, %s877_s28  ;;  %p886_p10 = scmp.lt.s32.totalorder %s877_s28, %s877_s28 }
  0x6a   : > { %p880_p1 = pnand %p878_p13, %p866_p4  ;;  %p887_p7 = por %p886_p10, %p885_p5 }
  0x6c   : > { %p881_p0 = pneg %p880_p1 }
  0x6e   : > { %p888_p9 = pnand %p887_p7, %p881_p0 }
  0x70   : > { %891 = shalt.err (!%p888_p9)
}
  0x71   : > { %727 = dma.hbm_to_vmem [thread:$0]  (!%p1386_p6), %s1353_s0, 512, %s1183_s30, [#allocation3], %s1017_s21, %s1017_s21, %s1018_s27  }
  0x72   : > { %s1387_s14 = sshll.u32 %s1008_s19, 7  ;;  %s1388_s24 = sshll.u32 %s1095_s25, 3 }
  0x73   : > { %s1247_s23 = scalar_lea.hbm %s1356_s3, %s1387_s14  ;;  %s242_s13 = scalar_lea.vmem [#allocation8], %s1388_s24 }
  0x74   : > { %s250_s1 = sshll.u32 %s242_s13, 4  ;;  %s239_s7 = scalar_lea.sflag [#allocation9], %s1095_s25  ;;  %s251_s1 = int_to_ptr.vmem [resolvable:$true] %s250_s1 }
  0x75   : > { %s892_s26 = scalar_lea.hbm %s1247_s23, 128  ;;  %p1389_p9 = scmp.ne.s32.totalorder %s1378_s12, 0 }
  0x76   : > { %p893_p7 = scmp.ne.s32.totalorder %s1247_s23, %s892_s26  ;;  %s897_s27 = scalar_lea.hbm %s1356_s3, 256 }
  0x77   : > { %p898_p4 = scmp.lt.u32.totalorder %s1247_s23, %s1356_s3  ;;  %p899_p8 = scmp.lt.u32.totalorder %s897_s27, %s892_s26 }
  0x78   : > { %p895_p3 = pnand %p893_p7, %p1389_p9  ;;  %p901_p11 = scmp.lt.u32.totalorder %s892_s26, %s1247_s23 }
  0x79   : > { %p900_p12 = por %p899_p8, %p898_p4 }
  0x7a   : > { %p896_p6 = pneg %p895_p3 }
  0x7b   : > { %p902_p2 = por %p901_p11, %p900_p12 }
  0x7d   : > { %p903_p13 = pnand %p902_p2, %p896_p6 }
  0x7f   : > { %906 = shalt.err (!%p903_p13)
}
  0x80   : > { %s907_s25 = scalar_lea.vmem %s251_s1, 128  ;;  %s1019_s10 = smov [#allocation8]  }
  0x81   : > { %p908_p1 = scmp.ne.s32.totalorder %s251_s1, %s907_s25  ;;  %s912_s14 = sshll.u32 %s1019_s10, 4  ;;  %s913_s14 = int_to_ptr.vmem [resolvable:$false] %s912_s14 }
  0x82   : > { %s914_s17 = scalar_lea.vmem %s913_s14, 256  ;;  %p915_p10 = scmp.lt.s32.totalorder %s251_s1, %s913_s14 }
  0x83   : > { %p910_p0 = pnand %p908_p1, %p1389_p9  ;;  %p916_p7 = scmp.lt.s32.totalorder %s914_s17, %s907_s25 }
  0x85   : > { %p911_p5 = pneg %p910_p0  ;;  %p917_p3 = por %p916_p7, %p915_p10 }
  0x87   : > { %p918_p4 = pnand %p917_p3, %p911_p5 }
  0x89   : > { %921 = shalt.err (!%p918_p4)
}
  0x8a   : > { %p1390_p8 = scmp.ne.s32.totalorder %s1377_s6, 0  ;;  %p1391_p6 = scmp.ne.s32.totalorder %s1383_s29, 0 }
  0x8b   : > { %p1392_p12 = scmp.eq.s32.totalorder (!%p1391_p6), %s1153_s22, 0 }
  0x8c   : > { %737 = dma.hbm_to_vmem [thread:$0]  (!%p1390_p8), %s1247_s23, 128, %s251_s1, %s239_s7  }
  0x8d   : > { %259 = sbr.rel (%p1391_p6) target bundleno = 920 (0x398), region = 36 }
  0x94   : > { %975 = dma.done.wait (%p1392_p12), [#allocation3], 512   ;;  %p1393_p9 = pmov %p1392_p12 }
  0x95   : > { %s265_s12 = sand.u32 1, %s1153_s22   ;;  %s1277_s11 = sand.u32 1, %s996_s16  }
  0x96   : > { %977 = vsyncadd (%p1393_p9), [#allocation3], 4294966784  ;;  %s1280_s24 = sshll.u32 %s1277_s11, 3  ;;  %s266_s6 = scalar_lea.sflag [#allocation6], %s265_s12 }
  0x97   : > { %s269_s23 = scalar_lea.vmem [#allocation5], %s1280_s24  ;;  %p1394_p11 = scmp.ne.s32.totalorder %s1379_s5, 0 }
  0x99   : > { %979 = dma.done.wait (%p1394_p11), %s266_s6, 384  }
  0x9a   : > { %981 = vsyncadd (%p1394_p11), %s266_s6, 4294966912  ;;  %s664_s29 = sshll.u32 %s1277_s11, 4  ;;  %s284_s22 = scalar_lea.sflag [#allocation9], %s1277_s11 }
  0x9b   : > { %s278_s13 = scalar_lea.vmem [#allocation7], %s664_s29  ;;  %s287_s1 = scalar_lea.vmem [#allocation8], %s1280_s24 }
  0x9c   : > { %983 = dma.done.wait (%p1394_p11), %s284_s22, 128  }
  0x9d   : > { %985 = vsyncadd (%p1394_p11), %s284_s22, 4294967168  ;;  %v1020_v0 = vmov 0.0|0.0   ;;  %vm1021_vm0 = vmmov 0   ;;  %v1022_v1 = vmov 0.0   ;;  %v322_v2 = vld [vmem:[#allocation2] sm:$0xff]  ;;  %v323_v3 = vld [vmem:[#allocation2 + $0x8] sm:$0xff] }
  0x9e   : > { %702 = vmatprep.subr.bf16.mxu0 %v1020_v0  ;;  %692 = vmatprep.mubr.msk.f32.mxu0 %vm1021_vm0, %v1022_v1  ;;  %v324_v4 = vld [vmem:[#allocation2 + $0x10] sm:$0xff]  ;;  %v703_v5 = vpack.c.bf16 %v323_v3, %v322_v2  ;;  %v325_v6 = vld [vmem:[#allocation2 + $0x18] sm:$0xff]  ;;  %vm329_vm1 = vcmask 261120   ;;  %v326_v11 = vld [vmem:[%s269_s23] sm:$0xff]  ;;  %vm485_vm4 = vcmask 130048   ;;  %s672_s5 = sshll.u32 %s1004_s18, 7 }
  0x9f   : > { %708 = vmatprep.subr.bf16.mxu1 %v1020_v0  ;;  %699 = vmatprep.mubr.msk.f32.mxu1 %vm1021_vm0, %v1022_v1  ;;  %v327_v7 = vld [vmem:[%s278_s13] sm:$0xff]  ;;  %v328_v8 = vld [vmem:[%s278_s13 + $0x8] sm:$0xff]  ;;  %vm710_vm2 = vmpackc.low %vm329_vm1, %vm329_vm1  ;;  %v706_v9 = vpack.c.bf16 %v325_v6, %v324_v4  ;;  %s321_s7 = scalar_lea.vmem [#allocation10], %s1280_s24  ;;  %s1303_s27 = scalar_lea.hbm %s1357_s4, %s672_s5 }
  0xa0   : > { %704 = vmatpush3.bf16.msra.mxu0 %v703_v5  ;;  %v709_v10 = vpack.c.bf16 %v328_v8, %v327_v7  ;;  %v482_v14 = vld [vmem:[%s287_s1] sm:$0xff]  ;;  %s513_s26 = sshll.u32 %s321_s7, 4  ;;  %s499_s28 = scalar_lea.sflag [#allocation4], %s1277_s11  ;;  %s1305_s26 = int_to_ptr.vmem [resolvable:$true] %s513_s26 }
  0xa1   : > { %705 = vmatprep.subr.bf16.mxu0 %v1020_v0  ;;  %vm483_vm3 = vcmp.ne.s32.totalorder %v482_v14, 0  ;;  %s922_s2 = scalar_lea.vmem %s1305_s26, 128  ;;  %p1395_p13 = scmp.ne.s32.totalorder %s1381_s8, 0 }
  0xa2   : > { %711 = vmatpush3.bf16.xpose.msk.msra.mxu1 %vm710_vm2, %v709_v10  ;;  %p923_p2 = scmp.ne.s32.totalorder %s1305_s26, %s922_s2  ;;  %s1023_s18 = smov [#allocation10]  }
  0xa3   : > { %s926_s25 = sshll.u32 %s1023_s18, 4  ;;  %s927_s25 = int_to_ptr.vmem [resolvable:$false] %s926_s25 }
  0xa4   : > { %707 = vmatpush3.bf16.msra.mxu0 %v706_v9  ;;  %p924_p1 = pnand %p923_p2, %p1395_p13  ;;  %s928_s10 = scalar_lea.vmem %s927_s25, 256 }
  0xa5   : > { %p929_p5 = scmp.lt.s32.totalorder %s1305_s26, %s927_s25  ;;  %p930_p10 = scmp.lt.s32.totalorder %s928_s10, %s922_s2 }
  0xa6   : > { %p925_p0 = pneg %p924_p1 }
  0xa7   : > { %693 = vmatmul.mubr.msk.f32.vlgmr.msra.gmra.mrb[0].mxu0 %vm329_vm1, %v326_v11  ;;  %p931_p7 = por %p930_p10, %p929_p5 }
  0xa9   : > { %p932_p3 = pnand %p931_p7, %p925_p0 }
 0x17a   : > { %v399_v12 = vpop.f32.mrb[0].mxu0 }
 0x17b   : > { %v694_v13 = vpop.f32.mrb[1].mxu0  ;;  %700 = vmatmul.mubr.msk.f32.vlgmr.msra.gmra.mrb[0].mxu1 %vm329_vm1, %v399_v12 }
 0x24e   : > { %v478_v15 = vpop.f32.mrb[0].mxu1 }
 0x24f   : > { %v484_v16 = vsel %vm483_vm3, -inf, %v478_v15  ;;  %v701_v17 = vpop.f32.mrb[1].mxu1 }
 0x250   : > { %v486_v18 = vsel %vm485_vm4, %v484_v16, -inf }
 0x251   : > { %487 = vmax.xlane.f32.xlu0 %v486_v18 }
 0x2de   : > { %v488_v19 = vpop.xlane.xlu0 %487 }
 0x2df   : > { %v489_v20 = vsub.f32 %v484_v16, %v488_v19 }
 0x2e1   : > { %v490_v21 = vmul.f32 1.442695, %v489_v20 }
 0x2e3   : > { %800 = vpow2.f32 %v490_v21 }
 0x2ed   : > { %v801_v22 = vpop.eup %800 }
 0x2ee   : > { %v492_v23 = vsel %vm485_vm4, %v801_v22, 0.0 }
 0x2ef   : > { %493 = vadd.xlane.f32.xlu0 %v492_v23 }
 0x37c   : > { %v494_v24 = vpop.xlane.xlu0 %493 }
 0x37d   : > { %802 = vrcp.f32 %v494_v24 }
 0x387   : > { %v803_v25 = vpop.eup %802 }
 0x388   : > { %v496_v26 = vmul.f32 %v803_v25, %v801_v22 }
 0x38a   : > { %497 = vst.msk [vmem:[%s321_s7] sm:$0xff] %vm485_vm4, %v496_v26 }
 0x38b   : > { %935 = shalt.err (!%p932_p3)
}
 0x38c   : > { %s936_s14 = scalar_lea.hbm %s1303_s27, 128  ;;  %s940_s11 = scalar_lea.hbm %s1357_s4, 256 }
 0x38d   : > { %p937_p4 = scmp.ne.s32.totalorder %s1303_s27, %s936_s14  ;;  %p941_p12 = scmp.lt.u32.totalorder %s1303_s27, %s1357_s4 }
 0x38e   : > { %p942_p9 = scmp.lt.u32.totalorder %s940_s11, %s936_s14  ;;  %p944_p2 = scmp.lt.u32.totalorder %s936_s14, %s1303_s27 }
 0x38f   : > { %p938_p8 = pnand %p937_p4, %p1395_p13 }
 0x390   : > { %p943_p11 = por %p942_p9, %p941_p12 }
 0x391   : > { %p939_p6 = pneg %p938_p8 }
 0x392   : > { %p945_p1 = por %p944_p2, %p943_p11 }
 0x394   : > { %p946_p0 = pnand %p945_p1, %p939_p6 }
 0x396   : > { %949 = shalt.err (!%p946_p0)
}
 0x397   : > { %722 = dma.vmem_to_hbm [thread:$0]  (%p1395_p13), %s1305_s26, 128, %s1303_s27, %s499_s28  }
 0x398 PF: > { %s525_s23 = sand.u32 1, %s992_s15   ;;  %p1396_p5 = scmp.ne.s32.totalorder %s1382_s9, 0 }
 0x399   : > { %p1397_p10 = scmp.ge.s32.totalorder %s1012_s20, 2  ;;  %s526_s29 = scalar_lea.sflag [#allocation4], %s525_s23 }
 0x39b   : > { %p739_p7 = pnand %p1397_p10, %p1396_p5 }
 0x39d   : > { %987 = dma.done.wait (!%p739_p7), %s526_s29, 128  }
 0x39e   : > { %989 = vsyncadd (!%p739_p7), %s526_s29, 4294967168  ;;  %s24_s20 = sadd.s32 1, %s1012_s20   ;;  %s1398_s13 = sld [smem:[#allocation15_spill]] }
 0x39f   : > { %p21_p3 = scmp.ge.s32.totalorder %s24_s20, 4   ;;  %s1399_s17 = sld [smem:[#allocation17_spill]] }
 0x3a0   : > { %s1400_s8 = sld [smem:[#allocation16_spill]]  ;;  %s1401_s15 = smov %s996_s16 }
 0x3a1   : > { %s1403_s18 = smov %s1008_s19  ;;  %23 = sbr.rel (!%p21_p3) target bundleno = 12 (0xc), region = 110 }
 0x3a4   : > { %s1402_s16 = smov %s1398_s13 }
 0x3a6   : > { %s1404_s19 = smov %s1400_s8 }
 0x3a8   :  { %531 = vsyncpa [#allocation3], 1 }
 0x3a9   :  { %533 = vsyncpa [#allocation3 + $0x1], 1 }
 0x3aa   :  { %534 = vsyncpa [#allocation6], 1 }
 0x3ab   :  { %536 = vsyncpa [#allocation6 + $0x1], 1 }
 0x3ac   :  { %537 = vsyncpa [#allocation9], 1 }
 0x3ad   :  { %539 = vsyncpa [#allocation9 + $0x1], 1 }
 0x3ae   :  { %540 = vsyncpa [#allocation4], 1 }
 0x3af   :  { %542 = vsyncpa [#allocation4 + $0x1], 1 }

</bundles_post_ra>
